<compile_context>
chip_gen: v6e
topology: v6e:2x2x1
jax: 0.10.0
libtpu: 0.0.40
codegen_flags: <defaults>
</compile_context>

<pallas_src>
import functools

import jax
import jax.numpy as jnp
from jax.experimental import pallas as pl
from jax.experimental.pallas import tpu as pltpu

LANES = 128
SUBLANES = 8
DESIRED_ROW_TILE = 2048   # 2048 x 128 f32 = 1 MiB per input block
NUM_CORE_CHUNKS = 2       # v7x has 2 TensorCores; harmless on v5e/v6e


def _charbonnier_kernel(pred_ref, tgt_ref, out_ref, *,
                        eps, row_tile, inner, rows_valid, full_tiles,
                        needs_mask):
    c = pl.program_id(0)   # core-chunk axis ("parallel")
    i = pl.program_id(1)   # reduction axis ("arbitrary")

    @pl.when(i == 0)
    def _init():
        out_ref[...] = jnp.zeros_like(out_ref)

    d = pred_ref[...].astype(jnp.float32) - tgt_ref[...].astype(jnp.float32)
    val = jnp.sqrt(d * d + eps)

    def _accum(v):
        # (row_tile, 128) -> (row_tile//8, 8, 128); summing the leading axis is
        # plain elementwise vreg adds (no cross-lane XLU work in the hot loop).
        out_ref[...] += v.reshape(row_tile // SUBLANES, SUBLANES, LANES).sum(axis=0)

    if needs_mask:
        # Only the (at most one) ragged/virtual tile per chunk pays for the
        # iota + select; all full tiles take the cheap path.
        t = c * inner + i   # global tile index

        @pl.when(t < full_tiles)
        def _full():
            _accum(val)

        @pl.when(t >= full_tiles)
        def _tail():
            row_ids = (jax.lax.broadcasted_iota(jnp.int32, val.shape, 0)
                       + t * row_tile)
            _accum(jnp.where(row_ids < rows_valid, val, 0.0))
    else:
        _accum(val)


def charbonnier_loss_pallas(pred, target, eps=1e-12, loss_weight=1.0):
    assert pred.shape == target.shape
    n_elems = int(pred.size)

    p = pred.reshape(-1)
    t = target.reshape(-1)

    # Pad only to a lane multiple (<= 127 elements), and only when necessary.
    pad_count = (-n_elems) % LANES
    if pad_count:
        # TODO(synk): jnp.pad copies the tensors; only hit when numel % 128 != 0.
        p = jnp.pad(p, (0, pad_count))
        t = jnp.pad(t, (0, pad_count))
    rows = (n_elems + pad_count) // LANES
    p2 = p.reshape(rows, LANES)
    t2 = t.reshape(rows, LANES)

    # Large, bandwidth-friendly row tile (multiple of 8 sublanes), capped for
    # small inputs.
    row_tile = min(DESIRED_ROW_TILE,
                   ((rows + SUBLANES - 1) // SUBLANES) * SUBLANES)
    row_tile = max(SUBLANES, row_tile)

    n_tiles = (rows + row_tile - 1) // row_tile
    num_chunks = min(NUM_CORE_CHUNKS, n_tiles)
    inner = (n_tiles + num_chunks - 1) // num_chunks

    full_tiles = rows // row_tile
    needs_mask = (rows % row_tile != 0) or (num_chunks * inner != n_tiles)

    def in_index_map(c, i):
        tidx = c * inner + i
        if num_chunks * inner > n_tiles:   # static: virtual tiles exist -> clamp
            tidx = jnp.minimum(tidx, n_tiles - 1)
        return (tidx, 0)

    kernel = functools.partial(
        _charbonnier_kernel,
        eps=float(eps),
        row_tile=row_tile,
        inner=inner,
        rows_valid=rows,
        full_tiles=full_tiles,
        needs_mask=needs_mask,
    )

    in_spec = pl.BlockSpec((row_tile, LANES), in_index_map)

    partial_sums = pl.pallas_call(
        kernel,
        out_shape=jax.ShapeDtypeStruct((num_chunks * SUBLANES, LANES),
                                       jnp.float32),
        grid_spec=pltpu.PrefetchScalarGridSpec(
            num_scalar_prefetch=0,
            grid=(num_chunks, inner),
            in_specs=[in_spec, in_spec],
            out_specs=pl.BlockSpec((SUBLANES, LANES), lambda c, i: (c, 0)),
        ),
        compiler_params=pltpu.CompilerParams(
            dimension_semantics=("parallel", "arbitrary")),
        cost_estimate=pl.CostEstimate(
            flops=5 * n_elems,
            transcendentals=n_elems,
            bytes_accessed=2 * n_elems * pred.dtype.itemsize),
    )(p2, t2)

    total = jnp.sum(partial_sums)
    if pad_count:
        # Padded zeros contribute exactly sqrt(eps) each under Charbonnier.
        total = total - pad_count * jnp.sqrt(jnp.float32(eps))
    return total * (float(loss_weight) / float(n_elems))


if __name__ == "__main__":
    key = jax.random.PRNGKey(0)
    k1, k2 = jax.random.split(key)
    # Shapes implied by the module docstring: (N, C, H, W)
    pred = jax.random.normal(k1, (2, 4, 16, 16), dtype=jnp.float32)
    target = jax.random.normal(k2, (2, 4, 16, 16), dtype=jnp.float32)

    eps = 1e-12
    loss_weight = 1.0

    loss = charbonnier_loss_pallas(pred, target, eps=eps, loss_weight=loss_weight)
    loss = jax.block_until_ready(loss)

    # Reference check in plain JAX.
    ref = loss_weight * jnp.mean(jnp.sqrt((pred - target) ** 2 + eps))
    assert jnp.allclose(loss, ref, rtol=1e-5, atol=1e-6), (loss, ref)

    print("KERNEL_OK")
</pallas_src>

<mosaic_0001>
module attributes {stable_mosaic.version = 11 : i64} {
  func.func @_charbonnier_kernel(%arg0: i32, %arg1: i32, %arg2: memref<16x128xf32, #tpu.memory_space<vmem>>, %arg3: memref<16x128xf32, #tpu.memory_space<vmem>>, %arg4: memref<8x128xf32, #tpu.memory_space<vmem>>) attributes {dimension_semantics = [#tpu.dimension_semantics<parallel>, #tpu.dimension_semantics<arbitrary>], iteration_bounds = array<i64: 1, 1>, scalar_prefetch = 0 : i64, scratch_operands = 0 : i64, tpu.core_type = #tpu.core_type<tc>, window_params = [{transform_indices = @transform_0, window_bounds = array<i64: 16, 128>}, {transform_indices = @transform_1, window_bounds = array<i64: 16, 128>}, {transform_indices = @transform_2, window_bounds = array<i64: 8, 128>}]} {
    %c0_i32 = arith.constant 0 : i32
    %0 = arith.cmpi eq, %arg1, %c0_i32 : i32
    %1 = arith.extui %0 : i1 to i32
    %c0_i32_0 = arith.constant 0 : i32
    %2 = arith.cmpi ne, %1, %c0_i32_0 : i32
    scf.if %2 {
      %cst_9 = arith.constant 0.000000e+00 : f32
      %15 = vector.broadcast %cst_9 : f32 to vector<8x128xf32>
      %c0_10 = arith.constant 0 : index
      %c0_11 = arith.constant 0 : index
      %16 = vector.load %arg4[%c0_10, %c0_11] : memref<8x128xf32, #tpu.memory_space<vmem>>, vector<8x128xf32>
      tpu.vector_store %arg4[%c0_10, %c0_11], %15 {strides = array<i32>} : memref<8x128xf32, #tpu.memory_space<vmem>>, vector<8x128xf32>,
    } else {
    }
    %c0 = arith.constant 0 : index
    %c0_1 = arith.constant 0 : index
    %3 = vector.load %arg2[%c0, %c0_1] : memref<16x128xf32, #tpu.memory_space<vmem>>, vector<16x128xf32>
    %c0_2 = arith.constant 0 : index
    %c0_3 = arith.constant 0 : index
    %4 = vector.load %arg3[%c0_2, %c0_3] : memref<16x128xf32, #tpu.memory_space<vmem>>, vector<16x128xf32>
    %5 = arith.subf %3, %4 : vector<16x128xf32>
    %6 = arith.mulf %5, %5 : vector<16x128xf32>
    %cst = arith.constant 9.99999996E-13 : f32
    %7 = vector.broadcast %cst : f32 to vector<16x128xf32>
    %8 = arith.addf %6, %7 : vector<16x128xf32>
    %9 = math.sqrt %8 : vector<16x128xf32>
    %c0_4 = arith.constant 0 : index
    %c0_5 = arith.constant 0 : index
    %10 = vector.load %arg4[%c0_4, %c0_5] : memref<8x128xf32, #tpu.memory_space<vmem>>, vector<8x128xf32>
    %11 = vector.shape_cast %9 : vector<16x128xf32> to vector<2x8x128xf32>
    %cst_6 = arith.constant dense<0.000000e+00> : vector<8x128xf32>
    %12 = vector.multi_reduction <add>, %11, %cst_6 [0] : vector<2x8x128xf32> to vector<8x128xf32>
    %13 = arith.addf %10, %12 : vector<8x128xf32>
    %c0_7 = arith.constant 0 : index
    %c0_8 = arith.constant 0 : index
    %14 = vector.load %arg4[%c0_7, %c0_8] : memref<8x128xf32, #tpu.memory_space<vmem>>, vector<8x128xf32>
    tpu.vector_store %arg4[%c0_7, %c0_8], %13 {strides = array<i32>} : memref<8x128xf32, #tpu.memory_space<vmem>>, vector<8x128xf32>,
    return
  }
  func.func @transform_0(%arg0: i32, %arg1: i32) -> (i32, i32) {
    %c1_i32 = arith.constant 1 : i32
    %0 = arith.muli %arg0, %c1_i32 : i32
    %1 = arith.addi %0, %arg1 : i32
    %c0_i32 = arith.constant 0 : i32
    %c0_i32_0 = arith.constant 0 : i32
    return %1, %c0_i32 : i32, i32
  }
  func.func @transform_1(%arg0: i32, %arg1: i32) -> (i32, i32) {
    %c1_i32 = arith.constant 1 : i32
    %0 = arith.muli %arg0, %c1_i32 : i32
    %1 = arith.addi %0, %arg1 : i32
    %c0_i32 = arith.constant 0 : i32
    %c0_i32_0 = arith.constant 0 : i32
    return %1, %c0_i32 : i32, i32
  }
  func.func @transform_2(%arg0: i32, %arg1: i32) -> (i32, i32) {
    %c0_i32 = arith.constant 0 : i32
    %c0_i32_0 = arith.constant 0 : i32
    return %arg0, %c0_i32 : i32, i32
  }
}

</mosaic_0001>

<bundles_post_ra>
// kernel: tpu_custom_call.1
= control target key start
LH: loop header
LB: loop body
LE: loop exit
PB: predicated region body
PF: predicated region fallthrough
CT: control target
= control target key end

     0   :  { %7 = vsyncpa [#allocation3], 0  ;;  %s206_s0 = inlined_call_operand.hbm [shape: f32[16,128], index: 0, kind: input, shape index: {}]   ;;  %s207_s1 = inlined_call_operand.hbm [shape: f32[16,128], index: 1, kind: input, shape index: {}]   ;;  %s208_s2 = inlined_call_operand.hbm [shape: f32[8,128], index: 2, kind: output, shape index: {}]  }
   0x1   :  { %8 = vsyncpa [#allocation6], 0 }
   0x2   :  { %9 = vsyncpa [#allocation4], 0  ;;  %s177_s9 = smov [#allocation2]  }
   0x3   :  { %s19_s10 = sshll.u32 %s177_s9, 4  ;;  %s20_s10 = int_to_ptr.vmem [resolvable:$true] %s19_s10 }
   0x4   :  { %s119_s11 = scalar_lea.vmem %s20_s10, 256  ;;  %p124_p1 = scmp.lt.s32.totalorder %s20_s10, %s20_s10 }
   0x5   :  { %p120_p0 = scmp.ne.s32.totalorder %s20_s10, %s119_s11  ;;  %p125_p2 = scmp.lt.s32.totalorder %s119_s11, %s119_s11 }
   0x7   :  { %p126_p3 = por %p125_p2, %p124_p1 }
   0x9   :  { %p127_p4 = pnand %p126_p3, %p120_p0 }
   0xb   :  { %130 = shalt.err (!%p127_p4)
}
   0xc   :  { %s178_s12 = smov 128   ;;  %s179_s13 = smov 8  }
   0xd   :  { %25 = dma.hbm_to_vmem [thread:$0]  %s206_s0, 256, %s20_s10, [#allocation3], %s178_s12, %s178_s12, %s179_s13  }
   0xe   :  { %s180_s16 = smov [#allocation5]  }
   0xf   :  { %s35_s17 = sshll.u32 %s180_s16, 4  ;;  %s36_s17 = int_to_ptr.vmem [resolvable:$true] %s35_s17 }
  0x10   :  { %s139_s18 = scalar_lea.vmem %s36_s17, 256  ;;  %p144_p6 = scmp.lt.s32.totalorder %s36_s17, %s36_s17 }
  0x11   :  { %p140_p5 = scmp.ne.s32.totalorder %s36_s17, %s139_s18  ;;  %p145_p7 = scmp.lt.s32.totalorder %s139_s18, %s139_s18 }
  0x13   :  { %p146_p8 = por %p145_p7, %p144_p6 }
  0x15   :  { %p147_p9 = pnand %p146_p8, %p140_p5 }
  0x17   :  { %150 = shalt.err (!%p147_p9)
}
  0x18   :  { %41 = dma.hbm_to_vmem [thread:$0]  %s207_s1, 256, %s36_s17, [#allocation6], %s178_s12, %s178_s12, %s179_s13  }
  0x19   :  { %171 = dma.done.wait [#allocation3], 256  }
  0x1a   :  { %172 = vsyncadd [#allocation3], 4294967040 }
  0x1b   :  { %173 = dma.done.wait [#allocation6], 256  }
  0x1c   :  { %174 = vsyncadd [#allocation6], 4294967040  ;;  %v57_v0 = vld [vmem:[#allocation2] sm:$0xff]  ;;  %v58_v1 = vld [vmem:[#allocation2 + $0x8] sm:$0xff]  ;;  %s181_s0 = smov [#allocation7]  }
  0x1d   :  { %v59_v2 = vld [vmem:[#allocation5] sm:$0xff]  ;;  %v60_v3 = vld [vmem:[#allocation5 + $0x8] sm:$0xff]  ;;  %s91_s1 = sshll.u32 %s181_s0, 4  ;;  %s92_s1 = int_to_ptr.vmem [resolvable:$true] %s91_s1 }
  0x1e   :  { %v61_v4 = vsub.f32 %v57_v0, %v59_v2  ;;  %v62_v5 = vsub.f32 %v58_v1, %v60_v3  ;;  %s151_s21 = scalar_lea.vmem %s92_s1, 128  ;;  %p156_p11 = scmp.lt.s32.totalorder %s92_s1, %s92_s1 }
  0x1f   :  { %p152_p10 = scmp.ne.s32.totalorder %s92_s1, %s151_s21  ;;  %p157_p12 = scmp.lt.s32.totalorder %s151_s21, %s151_s21 }
  0x20   :  { %v63_v6 = vmul.f32 %v61_v4, %v61_v4  ;;  %v64_v7 = vmul.f32 %v62_v5, %v62_v5 }
  0x21   :  { %p158_p13 = por %p157_p12, %p156_p11 }
  0x22   :  { %v65_v8 = vadd.f32 1e-12, %v63_v6  ;;  %v66_v9 = vadd.f32 1e-12, %v64_v7 }
  0x23   :  { %p159_p0 = pnand %p158_p13, %p152_p10 }
  0x24   :  { %107 = vrsqrt.f32 %v65_v8  ;;  %vm69_vm0 = vcmp.eq.f32.partialorder %v65_v8, inf  ;;  %v72_v11 = vand.u32 2147483648, %v65_v8  ;;  %vm71_vm1 = vcmp.eq.f32.partialorder %v65_v8, 0.0 }
  0x25   :  { %109 = vrsqrt.f32 %v66_v9  ;;  %vm76_vm2 = vcmp.eq.f32.partialorder %v66_v9, inf  ;;  %v79_v14 = vand.u32 2147483648, %v66_v9  ;;  %vm78_vm3 = vcmp.eq.f32.partialorder %v66_v9, 0.0 }
  0x31   :  { %v108_v10 = vpop.eup %107 }
  0x32   :  { %v110_v12 = vpop.eup %109  ;;  %v68_v13 = vmul.f32 %v108_v10, %v65_v8 }
  0x33   :  { %v75_v15 = vmul.f32 %v110_v12, %v66_v9 }
  0x34   :  { %v70_v16 = vsel %vm69_vm0, %v65_v8, %v68_v13 }
  0x35   :  { %v73_v17 = vsel %vm71_vm1, %v72_v11, %v70_v16  ;;  %v77_v18 = vsel %vm76_vm2, %v66_v9, %v75_v15 }
  0x36   :  { %v80_v19 = vsel %vm78_vm3, %v79_v14, %v77_v18 }
  0x37   :  { %v82_v20 = vadd.f32 %v80_v19, %v73_v17 }
  0x39   :  { %84 = vst [vmem:[#allocation7] sm:$0xff] %v82_v20 }
  0x3a   :  { %162 = shalt.err (!%p159_p0)
}
  0x3b   :  { %94 = dma.vmem_to_hbm [thread:$0]  %s92_s1, 128, %s208_s2, [#allocation4]  }
  0x3c   :  { %175 = dma.done.wait [#allocation4], 128  }
  0x3d   :  { %176 = vsyncadd [#allocation4], 4294967168 }
  0x3e   :  { %98 = vsyncpa [#allocation3], 1 }
  0x3f   :  { %99 = vsyncpa [#allocation6], 1 }
  0x40   :  { %100 = vsyncpa [#allocation4], 1 }

</bundles_post_ra>
